<compile_context>
chip_gen: v7x
topology: tpu7x:2x2x1
jax: 0.10.0
libtpu: 0.0.40
codegen_flags: <defaults>
</compile_context>

<pallas_src>
import jax
import jax.numpy as jnp
from jax.experimental import pallas as pl
from jax.experimental.pallas import tpu as pltpu

_LANE = 128      # vreg lane width (last dim)
_SUBLANE = 8     # vreg sublane count (second-to-last dim)


def _round_up(n, m):
    return -(-n // m) * m


def _vmem_capacity_bytes():
    try:
        return int(pltpu.get_tpu_info().vmem_capacity_bytes)
    except Exception:
        return 64 << 20  # conservative (v7x-sized) fallback


def _mlp_kernel(x_ref, w1_ref, b1_ref, w2_ref, b2_ref, o_ref, acc_ref):
    """One (batch-tile, dim_mid-slab) grid step of relu(x@W1 + b1)@W2 + b2."""
    k = pl.program_id(1)

    @pl.when(k == 0)
    def _init():
        acc_ref[...] = jnp.zeros_like(acc_ref)

    # fc1 slab on the MXU (compute-dtype operands, f32 accumulation),
    # bias + ReLU in f32 on the VPU.
    h = jnp.dot(x_ref[...].astype(w1_ref.dtype), w1_ref[...],
                preferred_element_type=jnp.float32)
    h = jnp.maximum(h + b1_ref[...], 0.0)
    # fc2 slab, accumulated into the f32 scratch across the dim_mid grid axis.
    acc_ref[...] += jnp.dot(h.astype(w2_ref.dtype), w2_ref[...],
                            preferred_element_type=jnp.float32)

    @pl.when(k == pl.num_programs(1) - 1)
    def _finalize():
        o_ref[...] = (acc_ref[...] + b2_ref[...]).astype(o_ref.dtype)


def _plan_block_k(dim_in, dim_mid, dim_out, vmem_cap, block_k=None):
    """Pick the dim_mid slab width tk. tk == dim_mid => weights fully resident."""
    if block_k is None:
        weight_bytes = (dim_in + dim_out) * dim_mid * 2  # bf16, single copy
        # Resident budget: tight on 64 MiB parts (v7x), roomy on 128 MiB parts.
        budget = (20 << 20) if vmem_cap <= (64 << 20) else (48 << 20)
        if weight_bytes <= budget:
            return dim_mid, dim_mid, 1                 # tk, padded dim_mid, grid_k
        # ~8 MiB of weight slab per k step (double-buffered while streaming).
        per_col = (dim_in + dim_out) * 2
        block_k = max(512, ((8 << 20) // per_col) // _LANE * _LANE)
    tk = _round_up(min(block_k, dim_mid), _LANE)
    if tk >= dim_mid:
        return dim_mid, dim_mid, 1
    dmid_p = _round_up(dim_mid, tk)
    return tk, dmid_p, dmid_p // tk


def _plan_block_m(B, dim_mid, vmem_cap):
    """Pick the batch tile tm (always a multiple of 8)."""
    if B <= 256:
        return _round_up(B, _SUBLANE)
    big_vmem = vmem_cap > (64 << 20)            # v5e / v6e (128 MiB VMEM)
    if dim_mid >= 2048 or B <= 1024:
        # >=2 grid steps so v7x's two TensorCores both get work, and the f32
        # intermediate h stays bounded when dim_mid is large.
        return 256
    if big_vmem and B >= 4096:
        return 1024
    return 512


def make_ava_model_mlp(w1, b1, w2, b2, *, compute_dtype=jnp.bfloat16,
                       block_k=None):
    """Prepare the MLP head once (cast/pad weights) and return apply(x).

    w1: [dim_in, dim_mid]  (PyTorch fc1.weight transposed), b1: [dim_mid]
    w2: [dim_mid, dim_out] (PyTorch fc2.weight transposed), b2: [dim_out]
    apply(x): [B, dim_in] -> [B, dim_out] in x.dtype.
    Matmuls run in `compute_dtype` (bf16 default) with f32 accumulation; pass
    compute_dtype=jnp.float32 for exact-precision (slower) matmuls.
    """
    dim_in, dim_mid = w1.shape
    dim_mid2, dim_out = w2.shape
    assert dim_mid == dim_mid2 and b1.shape == (dim_mid,) and b2.shape == (dim_out,)

    vmem_cap = _vmem_capacity_bytes()
    vmem_limit = (vmem_cap * 3) // 4
    tk, dmid_p, grid_k = _plan_block_k(dim_in, dim_mid, dim_out, vmem_cap, block_k)
    pad_k = dmid_p - dim_mid

    # One-time parameter prep (hoisted out of the per-call path). dim_mid is
    # zero-padded only when k-tiled: zero W1 columns / b1 entries give
    # relu(0 + 0) = 0, and zero W2 rows contribute exactly 0 to the output.
    w1p = jnp.pad(w1.astype(compute_dtype), ((0, 0), (0, pad_k)))
    w2p = jnp.pad(w2.astype(compute_dtype), ((0, pad_k), (0, 0)))
    b1p = jnp.pad(b1.astype(jnp.float32), ((0, pad_k),)).reshape(1, dmid_p)
    b2p = b2.astype(jnp.float32).reshape(1, dim_out)

    def _build(tm, grid_m, out_dtype, single_buffer_const):
        def const_spec(shape):
            kwargs = {}
            if single_buffer_const:
                # Constant block index -> one VMEM buffer is enough.
                kwargs = dict(pipeline_mode=pl.Buffered(1))
            return pl.BlockSpec(shape, lambda i, k: (0, 0), **kwargs)

        if grid_k == 1:
            w1_spec = const_spec((dim_in, tk))
            b1_spec = const_spec((1, tk))
            w2_spec = const_spec((tk, dim_out))
        else:
            w1_spec = pl.BlockSpec((dim_in, tk), lambda i, k: (0, k))
            b1_spec = pl.BlockSpec((1, tk), lambda i, k: (0, k))
            w2_spec = pl.BlockSpec((tk, dim_out), lambda i, k: (k, 0))
        b2_spec = const_spec((1, dim_out))

        io_bytes = jnp.dtype(out_dtype).itemsize
        cost = pl.CostEstimate(
            flops=2 * grid_m * tm * dim_mid * (dim_in + dim_out),
            transcendentals=0,
            bytes_accessed=(grid_m * tm * (dim_in + dim_out) * io_bytes
                            + w1p.size * w1p.dtype.itemsize
                            + w2p.size * w2p.dtype.itemsize
                            + (b1p.size + b2p.size) * 4),
        )
        return pl.pallas_call(
            _mlp_kernel,
            out_shape=jax.ShapeDtypeStruct((grid_m * tm, dim_out), out_dtype),
            grid_spec=pltpu.PrefetchScalarGridSpec(
                num_scalar_prefetch=0,
                grid=(grid_m, grid_k),
                in_specs=[
                    pl.BlockSpec((tm, dim_in), lambda i, k: (i, 0)),   # x tile
                    w1_spec, b1_spec, w2_spec, b2_spec,
                ],
                out_specs=pl.BlockSpec((tm, dim_out), lambda i, k: (i, 0)),
                scratch_shapes=[pltpu.VMEM((tm, dim_out), jnp.float32)],
            ),
            compiler_params=pltpu.CompilerParams(
                dimension_semantics=("parallel", "arbitrary"),
                vmem_limit_bytes=int(vmem_limit),
            ),
            cost_estimate=cost,
        )

    buffered_ok = [True]  # remember if Buffered(1) is supported by this build

    def apply(x):
        B, din = x.shape
        assert din == dim_in, (din, dim_in)
        out_dtype = x.dtype
        tm = _plan_block_m(B, dim_mid, vmem_cap)
        b_p = _round_up(B, tm)
        grid_m = b_p // tm
        xp = x if b_p == B else jnp.pad(x, ((0, b_p - B), (0, 0)))

        out_p = None
        if buffered_ok[0]:
            try:
                out_p = _build(tm, grid_m, out_dtype, True)(xp, w1p, b1p, w2p, b2p)
            except Exception:
                buffered_ok[0] = False  # drop the pipeline_mode hint and retry
        if out_p is None:
            out_p = _build(tm, grid_m, out_dtype, False)(xp, w1p, b1p, w2p, b2p)
        return out_p if b_p == B else out_p[:B]

    return apply


def ava_model_mlp(x, w1, b1, w2, b2, **kwargs):
    """One-shot convenience wrapper (prefer make_ava_model_mlp + reuse)."""
    return make_ava_model_mlp(w1, b1, w2, b2, **kwargs)(x)


def init_params(key, dim_in, dim_mid, dim_out, dtype=jnp.float32):
    """nn.Linear-style U(-1/sqrt(fan_in), 1/sqrt(fan_in)) init; weights are
    returned already transposed to [in, out] for the kernel."""
    k1, k2, k3, k4 = jax.random.split(key, 4)
    bound1 = 1.0 / jnp.sqrt(dim_in)
    bound2 = 1.0 / jnp.sqrt(dim_mid)
    w1 = jax.random.uniform(k1, (dim_in, dim_mid), dtype, -bound1, bound1)
    b1 = jax.random.uniform(k2, (dim_mid,), dtype, -bound1, bound1)
    w2 = jax.random.uniform(k3, (dim_mid, dim_out), dtype, -bound2, bound2)
    b2 = jax.random.uniform(k4, (dim_out,), dtype, -bound2, bound2)
    return w1, b1, w2, b2


if __name__ == "__main__":
    key = jax.random.PRNGKey(0)
    kx, kp, kx2, kp2 = jax.random.split(key, 4)

    # --- Test 1: small shapes consistent with AVAModelMLP.forward ([B, dim_in]).
    B, DIM_IN, DIM_MID, DIM_OUT = 8, 32, 64, 16
    x = jax.random.normal(kx, (B, DIM_IN), jnp.float32)
    w1, b1, w2, b2 = init_params(kp, DIM_IN, DIM_MID, DIM_OUT)
    mlp = make_ava_model_mlp(w1, b1, w2, b2)
    out = jax.block_until_ready(mlp(x))
    ref = jnp.maximum(x @ w1 + b1, 0.0) @ w2 + b2
    assert out.shape == (B, DIM_OUT) and out.dtype == x.dtype
    assert jnp.allclose(out, ref, atol=5e-2, rtol=5e-2), (
        float(jnp.max(jnp.abs(out - ref))))

    # --- Test 2: exercise batch tiling + the dim_mid reduction (k-tiled) path.
    B2, DIN2, DMID2, DOUT2 = 300, 192, 640, 48
    x2 = jax.random.normal(kx2, (B2, DIN2), jnp.float32)
    p2 = init_params(kp2, DIN2, DMID2, DOUT2)
    mlp2 = make_ava_model_mlp(*p2, block_k=256)   # force grid_k > 1
    out2 = jax.block_until_ready(mlp2(x2))
    ref2 = jnp.maximum(x2 @ p2[0] + p2[1], 0.0) @ p2[2] + p2[3]
    assert out2.shape == (B2, DOUT2)
    assert jnp.allclose(out2, ref2, atol=5e-2, rtol=5e-2), (
        float(jnp.max(jnp.abs(out2 - ref2))))

    print("KERNEL_OK")
</pallas_src>

<mosaic_0001>
module attributes {stable_mosaic.version = 11 : i64} {
  func.func @_mlp_kernel(%arg0: i32, %arg1: i32, %arg2: memref<8x32xf32, #tpu.memory_space<vmem>>, %arg3: memref<32x64xbf16, #tpu.memory_space<vmem>>, %arg4: memref<1x64xf32, #tpu.memory_space<vmem>>, %arg5: memref<64x16xbf16, #tpu.memory_space<vmem>>, %arg6: memref<1x16xf32, #tpu.memory_space<vmem>>, %arg7: memref<8x16xf32, #tpu.memory_space<vmem>>, %arg8: memref<8x16xf32, #tpu.memory_space<vmem>>) attributes {dimension_semantics = [#tpu.dimension_semantics<parallel>, #tpu.dimension_semantics<arbitrary>], iteration_bounds = array<i64: 1, 1>, scalar_prefetch = 0 : i64, scratch_operands = 1 : i64, tpu.core_type = #tpu.core_type<tc>, window_params = [{transform_indices = @transform_0, window_bounds = array<i64: 8, 32>}, {pipeline_mode = #tpu.pipeline_mode<synchronous>, transform_indices = @transform_1, window_bounds = array<i64: 32, 64>}, {pipeline_mode = #tpu.pipeline_mode<synchronous>, transform_indices = @transform_2, window_bounds = array<i64: 1, 64>}, {pipeline_mode = #tpu.pipeline_mode<synchronous>, transform_indices = @transform_3, window_bounds = array<i64: 64, 16>}, {pipeline_mode = #tpu.pipeline_mode<synchronous>, transform_indices = @transform_4, window_bounds = array<i64: 1, 16>}, {transform_indices = @transform_5, window_bounds = array<i64: 8, 16>}]} {
    %c0_i32 = arith.constant 0 : i32
    %0 = arith.cmpi eq, %arg1, %c0_i32 : i32
    %1 = arith.extui %0 : i1 to i32
    %c0_i32_0 = arith.constant 0 : i32
    %2 = arith.cmpi ne, %1, %c0_i32_0 : i32
    scf.if %2 {
      %cst_16 = arith.constant 0.000000e+00 : f32
      %21 = vector.broadcast %cst_16 : f32 to vector<8x16xf32>
      %c0_17 = arith.constant 0 : index
      %c0_18 = arith.constant 0 : index
      %22 = vector.load %arg8[%c0_17, %c0_18] : memref<8x16xf32, #tpu.memory_space<vmem>>, vector<8x16xf32>
      tpu.vector_store %arg8[%c0_17, %c0_18], %21 {strides = array<i32>} : memref<8x16xf32, #tpu.memory_space<vmem>>, vector<8x16xf32>,
    } else {
    }
    %c0 = arith.constant 0 : index
    %c0_1 = arith.constant 0 : index
    %3 = vector.load %arg2[%c0, %c0_1] : memref<8x32xf32, #tpu.memory_space<vmem>>, vector<8x32xf32>
    %4 = arith.truncf %3 : vector<8x32xf32> to vector<8x32xbf16>
    %c0_2 = arith.constant 0 : index
    %c0_3 = arith.constant 0 : index
    %5 = vector.load %arg3[%c0_2, %c0_3] : memref<32x64xbf16, #tpu.memory_space<vmem>>, vector<32x64xbf16>
    %cst = arith.constant dense<0.000000e+00> : vector<8x64xf32>
    %6 = tpu.matmul %4, %5, %cst {dimension_numbers = #tpu.dot_dimension_numbers<[1], [0], [0], [1], [0, 0, 1, 1], [], []>} : vector<8x32xbf16>, vector<32x64xbf16>, vector<8x64xf32> -> vector<8x64xf32>
    %c0_4 = arith.constant 0 : index
    %c0_5 = arith.constant 0 : index
    %7 = vector.load %arg4[%c0_4, %c0_5] : memref<1x64xf32, #tpu.memory_space<vmem>>, vector<1x64xf32>
    %8 = vector.broadcast %7 : vector<1x64xf32> to vector<8x64xf32>
    %9 = arith.addf %6, %8 : vector<8x64xf32>
    %cst_6 = arith.constant 0.000000e+00 : f32
    %10 = vector.broadcast %cst_6 : f32 to vector<8x64xf32>
    %11 = arith.maximumf %9, %10 : vector<8x64xf32>
    %c0_7 = arith.constant 0 : index
    %c0_8 = arith.constant 0 : index
    %12 = vector.load %arg8[%c0_7, %c0_8] : memref<8x16xf32, #tpu.memory_space<vmem>>, vector<8x16xf32>
    %13 = arith.truncf %11 : vector<8x64xf32> to vector<8x64xbf16>
    %c0_9 = arith.constant 0 : index
    %c0_10 = arith.constant 0 : index
    %14 = vector.load %arg5[%c0_9, %c0_10] : memref<64x16xbf16, #tpu.memory_space<vmem>>, vector<64x16xbf16>
    %cst_11 = arith.constant dense<0.000000e+00> : vector<8x16xf32>
    %15 = tpu.matmul %13, %14, %cst_11 {dimension_numbers = #tpu.dot_dimension_numbers<[1], [0], [0], [1], [0, 0, 1, 1], [], []>} : vector<8x64xbf16>, vector<64x16xbf16>, vector<8x16xf32> -> vector<8x16xf32>
    %16 = arith.addf %12, %15 : vector<8x16xf32>
    %c0_12 = arith.constant 0 : index
    %c0_13 = arith.constant 0 : index
    %17 = vector.load %arg8[%c0_12, %c0_13] : memref<8x16xf32, #tpu.memory_space<vmem>>, vector<8x16xf32>
    tpu.vector_store %arg8[%c0_12, %c0_13], %16 {strides = array<i32>} : memref<8x16xf32, #tpu.memory_space<vmem>>, vector<8x16xf32>,
    %c0_i32_14 = arith.constant 0 : i32
    %18 = arith.cmpi eq, %arg1, %c0_i32_14 : i32
    %19 = arith.extui %18 : i1 to i32
    %c0_i32_15 = arith.constant 0 : i32
    %20 = arith.cmpi ne, %19, %c0_i32_15 : i32
    scf.if %20 {
      %c0_16 = arith.constant 0 : index
      %c0_17 = arith.constant 0 : index
      %21 = vector.load %arg8[%c0_16, %c0_17] : memref<8x16xf32, #tpu.memory_space<vmem>>, vector<8x16xf32>
      %c0_18 = arith.constant 0 : index
      %c0_19 = arith.constant 0 : index
      %22 = vector.load %arg6[%c0_18, %c0_19] : memref<1x16xf32, #tpu.memory_space<vmem>>, vector<1x16xf32>
      %23 = vector.broadcast %22 : vector<1x16xf32> to vector<8x16xf32>
      %24 = arith.addf %21, %23 : vector<8x16xf32>
      %c0_20 = arith.constant 0 : index
      %c0_21 = arith.constant 0 : index
      %25 = vector.load %arg7[%c0_20, %c0_21] : memref<8x16xf32, #tpu.memory_space<vmem>>, vector<8x16xf32>
      tpu.vector_store %arg7[%c0_20, %c0_21], %24 {strides = array<i32>} : memref<8x16xf32, #tpu.memory_space<vmem>>, vector<8x16xf32>,
    } else {
    }
    return
  }
  func.func @transform_0(%arg0: i32, %arg1: i32) -> (i32, i32) {
    %c0_i32 = arith.constant 0 : i32
    %c0_i32_0 = arith.constant 0 : i32
    return %arg0, %c0_i32 : i32, i32
  }
  func.func @transform_1(%arg0: i32, %arg1: i32) -> (i32, i32) {
    %c0_i32 = arith.constant 0 : i32
    %c0_i32_0 = arith.constant 0 : i32
    %c0_i32_1 = arith.constant 0 : i32
    return %c0_i32, %c0_i32_0 : i32, i32
  }
  func.func @transform_2(%arg0: i32, %arg1: i32) -> (i32, i32) {
    %c0_i32 = arith.constant 0 : i32
    %c0_i32_0 = arith.constant 0 : i32
    %c0_i32_1 = arith.constant 0 : i32
    return %c0_i32, %c0_i32_0 : i32, i32
  }
  func.func @transform_3(%arg0: i32, %arg1: i32) -> (i32, i32) {
    %c0_i32 = arith.constant 0 : i32
    %c0_i32_0 = arith.constant 0 : i32
    %c0_i32_1 = arith.constant 0 : i32
    return %c0_i32, %c0_i32_0 : i32, i32
  }
  func.func @transform_4(%arg0: i32, %arg1: i32) -> (i32, i32) {
    %c0_i32 = arith.constant 0 : i32
    %c0_i32_0 = arith.constant 0 : i32
    %c0_i32_1 = arith.constant 0 : i32
    return %c0_i32, %c0_i32_0 : i32, i32
  }
  func.func @transform_5(%arg0: i32, %arg1: i32) -> (i32, i32) {
    %c0_i32 = arith.constant 0 : i32
    %c0_i32_0 = arith.constant 0 : i32
    return %arg0, %c0_i32 : i32, i32
  }
}

module attributes {stable_mosaic.version = 11 : i64} {
  func.func @_mlp_kernel(%arg0: i32, %arg1: i32, %arg2: memref<8x32xf32, #tpu.memory_space<vmem>>, %arg3: memref<32x64xbf16, #tpu.memory_space<vmem>>, %arg4: memref<1x64xf32, #tpu.memory_space<vmem>>, %arg5: memref<64x16xbf16, #tpu.memory_space<vmem>>, %arg6: memref<1x16xf32, #tpu.memory_space<vmem>>, %arg7: memref<8x16xf32, #tpu.memory_space<vmem>>, %arg8: memref<8x16xf32, #tpu.memory_space<vmem>>) attributes {dimension_semantics = [#tpu.dimension_semantics<parallel>, #tpu.dimension_semantics<arbitrary>], iteration_bounds = array<i64: 1, 1>, scalar_prefetch = 0 : i64, scratch_operands = 1 : i64, tpu.core_type = #tpu.core_type<tc>, window_params = [{transform_indices = @transform_0, window_bounds = array<i64: 8, 32>}, {pipeline_mode = #tpu.pipeline_mode<synchronous>, transform_indices = @transform_1, window_bounds = array<i64: 32, 64>}, {pipeline_mode = #tpu.pipeline_mode<synchronous>, transform_indices = @transform_2, window_bounds = array<i64: 1, 64>}, {pipeline_mode = #tpu.pipeline_mode<synchronous>, transform_indices = @transform_3, window_bounds = array<i64: 64, 16>}, {pipeline_mode = #tpu.pipeline_mode<synchronous>, transform_indices = @transform_4, window_bounds = array<i64: 1, 16>}, {transform_indices = @transform_5, window_bounds = array<i64: 8, 16>}]} {
    %c0_i32 = arith.constant 0 : i32
    %0 = arith.cmpi eq, %arg1, %c0_i32 : i32
    %1 = arith.extui %0 : i1 to i32
    %c0_i32_0 = arith.constant 0 : i32
    %2 = arith.cmpi ne, %1, %c0_i32_0 : i32
    scf.if %2 {
      %cst_16 = arith.constant 0.000000e+00 : f32
      %21 = vector.broadcast %cst_16 : f32 to vector<8x16xf32>
      %c0_17 = arith.constant 0 : index
      %c0_18 = arith.constant 0 : index
      %22 = vector.load %arg8[%c0_17, %c0_18] : memref<8x16xf32, #tpu.memory_space<vmem>>, vector<8x16xf32>
      tpu.vector_store %arg8[%c0_17, %c0_18], %21 {strides = array<i32>} : memref<8x16xf32, #tpu.memory_space<vmem>>, vector<8x16xf32>,
    } else {
    }
    %c0 = arith.constant 0 : index
    %c0_1 = arith.constant 0 : index
    %3 = vector.load %arg2[%c0, %c0_1] : memref<8x32xf32, #tpu.memory_space<vmem>>, vector<8x32xf32>
    %4 = arith.truncf %3 : vector<8x32xf32> to vector<8x32xbf16>
    %c0_2 = arith.constant 0 : index
    %c0_3 = arith.constant 0 : index
    %5 = vector.load %arg3[%c0_2, %c0_3] : memref<32x64xbf16, #tpu.memory_space<vmem>>, vector<32x64xbf16>
    %cst = arith.constant dense<0.000000e+00> : vector<8x64xf32>
    %6 = tpu.matmul %4, %5, %cst {dimension_numbers = #tpu.dot_dimension_numbers<[1], [0], [0], [1], [0, 0, 1, 1], [], []>} : vector<8x32xbf16>, vector<32x64xbf16>, vector<8x64xf32> -> vector<8x64xf32>
    %c0_4 = arith.constant 0 : index
    %c0_5 = arith.constant 0 : index
    %7 = vector.load %arg4[%c0_4, %c0_5] : memref<1x64xf32, #tpu.memory_space<vmem>>, vector<1x64xf32>
    %8 = vector.broadcast %7 : vector<1x64xf32> to vector<8x64xf32>
    %9 = arith.addf %6, %8 : vector<8x64xf32>
    %cst_6 = arith.constant 0.000000e+00 : f32
    %10 = vector.broadcast %cst_6 : f32 to vector<8x64xf32>
    %11 = arith.maximumf %9, %10 : vector<8x64xf32>
    %c0_7 = arith.constant 0 : index
    %c0_8 = arith.constant 0 : index
    %12 = vector.load %arg8[%c0_7, %c0_8] : memref<8x16xf32, #tpu.memory_space<vmem>>, vector<8x16xf32>
    %13 = arith.truncf %11 : vector<8x64xf32> to vector<8x64xbf16>
    %c0_9 = arith.constant 0 : index
    %c0_10 = arith.constant 0 : index
    %14 = vector.load %arg5[%c0_9, %c0_10] : memref<64x16xbf16, #tpu.memory_space<vmem>>, vector<64x16xbf16>
    %cst_11 = arith.constant dense<0.000000e+00> : vector<8x16xf32>
    %15 = tpu.matmul %13, %14, %cst_11 {dimension_numbers = #tpu.dot_dimension_numbers<[1], [0], [0], [1], [0, 0, 1, 1], [], []>} : vector<8x64xbf16>, vector<64x16xbf16>, vector<8x16xf32> -> vector<8x16xf32>
    %16 = arith.addf %12, %15 : vector<8x16xf32>
    %c0_12 = arith.constant 0 : index
    %c0_13 = arith.constant 0 : index
    %17 = vector.load %arg8[%c0_12, %c0_13] : memref<8x16xf32, #tpu.memory_space<vmem>>, vector<8x16xf32>
    tpu.vector_store %arg8[%c0_12, %c0_13], %16 {strides = array<i32>} : memref<8x16xf32, #tpu.memory_space<vmem>>, vector<8x16xf32>,
    %c0_i32_14 = arith.constant 0 : i32
    %18 = arith.cmpi eq, %arg1, %c0_i32_14 : i32
    %19 = arith.extui %18 : i1 to i32
    %c0_i32_15 = arith.constant 0 : i32
    %20 = arith.cmpi ne, %19, %c0_i32_15 : i32
    scf.if %20 {
      %c0_16 = arith.constant 0 : index
      %c0_17 = arith.constant 0 : index
      %21 = vector.load %arg8[%c0_16, %c0_17] : memref<8x16xf32, #tpu.memory_space<vmem>>, vector<8x16xf32>
      %c0_18 = arith.constant 0 : index
      %c0_19 = arith.constant 0 : index
      %22 = vector.load %arg6[%c0_18, %c0_19] : memref<1x16xf32, #tpu.memory_space<vmem>>, vector<1x16xf32>
      %23 = vector.broadcast %22 : vector<1x16xf32> to vector<8x16xf32>
      %24 = arith.addf %21, %23 : vector<8x16xf32>
      %c0_20 = arith.constant 0 : index
      %c0_21 = arith.constant 0 : index
      %25 = vector.load %arg7[%c0_20, %c0_21] : memref<8x16xf32, #tpu.memory_space<vmem>>, vector<8x16xf32>
      tpu.vector_store %arg7[%c0_20, %c0_21], %24 {strides = array<i32>} : memref<8x16xf32, #tpu.memory_space<vmem>>, vector<8x16xf32>,
    } else {
    }
    return
  }
  func.func @transform_0(%arg0: i32, %arg1: i32) -> (i32, i32) {
    %c0_i32 = arith.constant 0 : i32
    %c0_i32_0 = arith.constant 0 : i32
    return %arg0, %c0_i32 : i32, i32
  }
  func.func @transform_1(%arg0: i32, %arg1: i32) -> (i32, i32) {
    %c0_i32 = arith.constant 0 : i32
    %c0_i32_0 = arith.constant 0 : i32
    %c0_i32_1 = arith.constant 0 : i32
    return %c0_i32, %c0_i32_0 : i32, i32
  }
  func.func @transform_2(%arg0: i32, %arg1: i32) -> (i32, i32) {
    %c0_i32 = arith.constant 0 : i32
    %c0_i32_0 = arith.constant 0 : i32
    %c0_i32_1 = arith.constant 0 : i32
    return %c0_i32, %c0_i32_0 : i32, i32
  }
  func.func @transform_3(%arg0: i32, %arg1: i32) -> (i32, i32) {
    %c0_i32 = arith.constant 0 : i32
    %c0_i32_0 = arith.constant 0 : i32
    %c0_i32_1 = arith.constant 0 : i32
    return %c0_i32, %c0_i32_0 : i32, i32
  }
  func.func @transform_4(%arg0: i32, %arg1: i32) -> (i32, i32) {
    %c0_i32 = arith.constant 0 : i32
    %c0_i32_0 = arith.constant 0 : i32
    %c0_i32_1 = arith.constant 0 : i32
    return %c0_i32, %c0_i32_0 : i32, i32
  }
  func.func @transform_5(%arg0: i32, %arg1: i32) -> (i32, i32) {
    %c0_i32 = arith.constant 0 : i32
    %c0_i32_0 = arith.constant 0 : i32
    return %arg0, %c0_i32 : i32, i32
  }
}

</mosaic_0001>

<bundles_post_ra>
// kernel: tpu_custom_call.1
= control target key start
LH: loop header
LB: loop body
LE: loop exit
PB: predicated region body
PF: predicated region fallthrough
CT: control target
= control target key end

     0   :  { %v277_v1 = vmov 0.0   ;;  %vm278_vm0 = vmmov 0   ;;  %vm53_vm1 = vcmask 261120   ;;  %s352_s0 = inlined_call_operand.vmem [shape: f32[8,32], index: 0, kind: input, shape index: {}]   ;;  %s353_s1 = inlined_call_operand.vmem [shape: bf16[32,64], index: 1, kind: input, shape index: {}]   ;;  %s354_s2 = inlined_call_operand.vmem [shape: f32[1,64], index: 2, kind: input, shape index: {}]   ;;  %s355_s3 = inlined_call_operand.vmem [shape: bf16[64,16], index: 3, kind: input, shape index: {}]   ;;  %s356_s4 = inlined_call_operand.vmem [shape: f32[1,16], index: 4, kind: input, shape index: {}]   ;;  %s357_s5 = inlined_call_operand.hbm [shape: f32[8,16], index: 5, kind: output, shape index: {}]  }
   0x1   :  { %v247_v0 = vld [vmem:[%s353_s1] sm:$0xff]   ;;  %224 = vmatprep.subr.bf16.mxu0 %v277_v1  ;;  %v248_v2 = vld [vmem:[%s353_s1 + $0x8] sm:$0xff]   ;;  %232 = vmatprep.subr.bf16.mxu1 %v277_v1 }
   0x2   :  { %225 = vmatpush3.bf16.msra.mxu0 %v247_v0  ;;  %228 = vmatprep.mubr.msk.bf16.mxu0 %vm278_vm0, %v277_v1  ;;  %v28_v3 = vld [vmem:[%s352_s0] sm:$0xff]  ;;  %v250_v5 = vld [vmem:[%s355_s3 + $0x8] sm:$0xff]  }
   0x3   :  { %226 = vmatprep.subr.bf16.mxu0 %v277_v1  ;;  %v249_v4 = vld [vmem:[%s355_s3] sm:$0xff]   ;;  %240 = vmatprep.mubr.msk.bf16.mxu1 %vm278_vm0, %v277_v1  ;;  %v29_v6 = vpack.c.bf16 %v28_v3, %v28_v3 }
   0x4   :  { %233 = vmatpush3.bf16.msra.mxu1 %v249_v4 }
   0x5   :  { %234 = vmatprep.subr.bf16.mxu1 %v277_v1 }
   0x6   :  { %227 = vmatpush3.bf16.msra.mxu0 %v248_v2 }
   0x7   :  { %10 = vsyncpa [#allocation4], 0  ;;  %v251_v7 = vld [vmem:[%s355_s3 + $0x10] sm:$0xff]   ;;  %v252_v8 = vld [vmem:[%s355_s3 + $0x18] sm:$0xff]   ;;  %vm26_vm2 = vcmask 130048   ;;  %vm132_vm3 = vcmask 523264  }
   0x8   :  { %235 = vmatpush3.bf16.msra.mxu1 %v250_v5  ;;  %27 = vst.msk [vmem:[#allocation2] sm:$0xff] %vm26_vm2, %v277_v1  ;;  %v206_v9 = vld [vmem:[%s354_s2] ss:$0 sm:$0xff]  ;;  %s279_s2 = smov [#allocation3]  }
   0x9   :  { %229 = vmatmul.mubr.msk.bf16.vlgmr.msra.gmra.mrb[0].mxu0 %vm53_vm1, %v29_v6  ;;  %236 = vmatprep.subr.bf16.mxu1 %v277_v1  ;;  %v215_v23 = vld [vmem:[%s356_s4] ss:$0 sm:$0xff]  ;;  %s198_s8 = sshll.u32 %s279_s2, 4  ;;  %s199_s8 = int_to_ptr.vmem [resolvable:$true] %s198_s8 }
   0xa   :  { %s253_s9 = scalar_lea.vmem %s199_s8, 128  ;;  %p258_p1 = scmp.lt.s32.totalorder %s199_s8, %s199_s8 }
   0xb   :  { %p254_p0 = scmp.ne.s32.totalorder %s199_s8, %s253_s9  ;;  %p259_p2 = scmp.lt.s32.totalorder %s253_s9, %s253_s9 }
   0xc   :  { %237 = vmatpush3.bf16.msra.mxu1 %v251_v7 }
   0xd   :  { %238 = vmatprep.subr.bf16.mxu1 %v277_v1  ;;  %p260_p3 = por %p259_p2, %p258_p1 }
   0xf   :  { %v98_v17 = vld [vmem:[#allocation2] sm:$0xff]  ;;  %p261_p4 = pnand %p260_p3, %p254_p0 }
  0x10   :  { %239 = vmatpush3.bf16.msra.mxu1 %v252_v8 }
  0xdc   :  { %v91_v10 = vpop.f32.mrb[0].mxu0 }
  0xdd   :  { %v92_v11 = vadd.f32 %v206_v9, %v91_v10  ;;  %v230_v12 = vpop.f32.mrb[1].mxu0 }
  0xde   :  { %v94_v13 = vpop.f32.mrb[2].mxu0 }
  0xdf   :  { %v97_v14 = vmax.f32 %v92_v11, 0.0  ;;  %v231_v15 = vpop.f32.mrb[3].mxu0 }
  0xe1   :  { %v99_v16 = vpack.c.bf16 %v97_v14, %v97_v14 }
  0xe3   :  { %241 = vmatmul.mubr.msk.bf16.vlgmr.msra.gmra.mrb[0].mxu1 %vm132_vm3, %v99_v16 }
 0x1b6   :  { %v170_v18 = vpop.f32.mrb[0].mxu1 }
 0x1b7   :  { %v176_v19 = vadd.f32 %v170_v18, %v98_v17  ;;  %v242_v20 = vpop.f32.mrb[1].mxu1 }
 0x1b8   :  { %v173_v21 = vpop.f32.mrb[2].mxu1 }
 0x1b9   :  { %178 = vst.msk [vmem:[#allocation2] sm:$0xff] %vm26_vm2, %v176_v19  ;;  %v243_v22 = vpop.f32.mrb[3].mxu1 }
 0x1c0   :  { %v182_v24 = vld [vmem:[#allocation2] sm:$0xff] }
 0x1c1   :  { %v190_v25 = vadd.f32 %v215_v23, %v182_v24 }
 0x1c3   :  { %191 = vst.msk [vmem:[#allocation3] sm:$0xff] %vm26_vm2, %v190_v25 }
 0x1c4   :  { %264 = shalt.err (!%p261_p4)
}
 0x1c5   :  { %s265_s12 = scalar_lea.hbm %s357_s5, 128 }
 0x1c6   :  { %p266_p5 = scmp.ne.s32.totalorder %s357_s5, %s265_s12  ;;  %p269_p6 = scmp.lt.u32.totalorder %s265_s12, %s357_s5 }
 0x1c8   :  { %p271_p7 = pnand %p269_p6, %p266_p5 }
 0x1ca   :  { %274 = shalt.err (!%p271_p7)
}
 0x1cb   :  { %201 = dma.vmem_to_hbm [thread:$0]  %s199_s8, 128, %s357_s5, [#allocation4]  }
 0x1cc   :  { %275 = dma.done.wait [#allocation4], 128  }
 0x1cd   :  { %276 = vsyncadd [#allocation4], 4294967168 }
 0x1ce   :  { %205 = vsyncpa [#allocation4], 1 }

// kernel: tpu_custom_call.1
= control target key start
LH: loop header
LB: loop body
LE: loop exit
PB: predicated region body
PF: predicated region fallthrough
CT: control target
= control target key end

     0   :  { %v277_v1 = vmov 0.0   ;;  %vm278_vm0 = vmmov 0   ;;  %vm53_vm1 = vcmask 261120   ;;  %s352_s0 = inlined_call_operand.vmem [shape: f32[8,32], index: 0, kind: input, shape index: {}]   ;;  %s353_s1 = inlined_call_operand.vmem [shape: bf16[32,64], index: 1, kind: input, shape index: {}]   ;;  %s354_s2 = inlined_call_operand.vmem [shape: f32[1,64], index: 2, kind: input, shape index: {}]   ;;  %s355_s3 = inlined_call_operand.vmem [shape: bf16[64,16], index: 3, kind: input, shape index: {}]   ;;  %s356_s4 = inlined_call_operand.vmem [shape: f32[1,16], index: 4, kind: input, shape index: {}]   ;;  %s357_s5 = inlined_call_operand.hbm [shape: f32[8,16], index: 5, kind: output, shape index: {}]  }
   0x1   :  { %v247_v0 = vld [vmem:[%s353_s1] sm:$0xff]   ;;  %224 = vmatprep.subr.bf16.mxu0 %v277_v1  ;;  %v248_v2 = vld [vmem:[%s353_s1 + $0x8] sm:$0xff]   ;;  %232 = vmatprep.subr.bf16.mxu1 %v277_v1 }
   0x2   :  { %225 = vmatpush3.bf16.msra.mxu0 %v247_v0  ;;  %228 = vmatprep.mubr.msk.bf16.mxu0 %vm278_vm0, %v277_v1  ;;  %v28_v3 = vld [vmem:[%s352_s0] sm:$0xff]  ;;  %v250_v5 = vld [vmem:[%s355_s3 + $0x8] sm:$0xff]  }
   0x3   :  { %226 = vmatprep.subr.bf16.mxu0 %v277_v1  ;;  %v249_v4 = vld [vmem:[%s355_s3] sm:$0xff]   ;;  %240 = vmatprep.mubr.msk.bf16.mxu1 %vm278_vm0, %v277_v1  ;;  %v29_v6 = vpack.c.bf16 %v28_v3, %v28_v3 }
   0x4   :  { %233 = vmatpush3.bf16.msra.mxu1 %v249_v4 }
   0x5   :  { %234 = vmatprep.subr.bf16.mxu1 %v277_v1 }
   0x6   :  { %227 = vmatpush3.bf16.msra.mxu0 %v248_v2 }
   0x7   :  { %10 = vsyncpa [#allocation4], 0  ;;  %v251_v7 = vld [vmem:[%s355_s3 + $0x10] sm:$0xff]   ;;  %v252_v8 = vld [vmem:[%s355_s3 + $0x18] sm:$0xff]   ;;  %vm26_vm2 = vcmask 130048   ;;  %vm132_vm3 = vcmask 523264  }
   0x8   :  { %235 = vmatpush3.bf16.msra.mxu1 %v250_v5  ;;  %27 = vst.msk [vmem:[#allocation2] sm:$0xff] %vm26_vm2, %v277_v1  ;;  %v206_v9 = vld [vmem:[%s354_s2] ss:$0 sm:$0xff]  ;;  %s279_s2 = smov [#allocation3]  }
   0x9   :  { %229 = vmatmul.mubr.msk.bf16.vlgmr.msra.gmra.mrb[0].mxu0 %vm53_vm1, %v29_v6  ;;  %236 = vmatprep.subr.bf16.mxu1 %v277_v1  ;;  %v215_v23 = vld [vmem:[%s356_s4] ss:$0 sm:$0xff]  ;;  %s198_s8 = sshll.u32 %s279_s2, 4  ;;  %s199_s8 = int_to_ptr.vmem [resolvable:$true] %s198_s8 }
   0xa   :  { %s253_s9 = scalar_lea.vmem %s199_s8, 128  ;;  %p258_p1 = scmp.lt.s32.totalorder %s199_s8, %s199_s8 }
   0xb   :  { %p254_p0 = scmp.ne.s32.totalorder %s199_s8, %s253_s9  ;;  %p259_p2 = scmp.lt.s32.totalorder %s253_s9, %s253_s9 }
   0xc   :  { %237 = vmatpush3.bf16.msra.mxu1 %v251_v7 }
   0xd   :  { %238 = vmatprep.subr.bf16.mxu1 %v277_v1  ;;  %p260_p3 = por %p259_p2, %p258_p1 }
   0xf   :  { %v98_v17 = vld [vmem:[#allocation2] sm:$0xff]  ;;  %p261_p4 = pnand %p260_p3, %p254_p0 }
  0x10   :  { %239 = vmatpush3.bf16.msra.mxu1 %v252_v8 }
  0xdc   :  { %v91_v10 = vpop.f32.mrb[0].mxu0 }
  0xdd   :  { %v92_v11 = vadd.f32 %v206_v9, %v91_v10  ;;  %v230_v12 = vpop.f32.mrb[1].mxu0 }
  0xde   :  { %v94_v13 = vpop.f32.mrb[2].mxu0 }
  0xdf   :  { %v97_v14 = vmax.f32 %v92_v11, 0.0  ;;  %v231_v15 = vpop.f32.mrb[3].mxu0 }
  0xe1   :  { %v99_v16 = vpack.c.bf16 %v97_v14, %v97_v14 }
  0xe3   :  { %241 = vmatmul.mubr.msk.bf16.vlgmr.msra.gmra.mrb[0].mxu1 %vm132_vm3, %v99_v16 }
 0x1b6   :  { %v170_v18 = vpop.f32.mrb[0].mxu1 }
 0x1b7   :  { %v176_v19 = vadd.f32 %v170_v18, %v98_v17  ;;  %v242_v20 = vpop.f32.mrb[1].mxu1 }
 0x1b8   :  { %v173_v21 = vpop.f32.mrb[2].mxu1 }
 0x1b9   :  { %178 = vst.msk [vmem:[#allocation2] sm:$0xff] %vm26_vm2, %v176_v19  ;;  %v243_v22 = vpop.f32.mrb[3].mxu1 }
 0x1c0   :  { %v182_v24 = vld [vmem:[#allocation2] sm:$0xff] }
 0x1c1   :  { %v190_v25 = vadd.f32 %v215_v23, %v182_v24 }
 0x1c3   :  { %191 = vst.msk [vmem:[#allocation3] sm:$0xff] %vm26_vm2, %v190_v25 }
 0x1c4   :  { %264 = shalt.err (!%p261_p4)
}
 0x1c5   :  { %s265_s12 = scalar_lea.hbm %s357_s5, 128 }
 0x1c6   :  { %p266_p5 = scmp.ne.s32.totalorder %s357_s5, %s265_s12  ;;  %p269_p6 = scmp.lt.u32.totalorder %s265_s12, %s357_s5 }
 0x1c8   :  { %p271_p7 = pnand %p269_p6, %p266_p5 }
 0x1ca   :  { %274 = shalt.err (!%p271_p7)
}
 0x1cb   :  { %201 = dma.vmem_to_hbm [thread:$0]  %s199_s8, 128, %s357_s5, [#allocation4]  }
 0x1cc   :  { %275 = dma.done.wait [#allocation4], 128  }
 0x1cd   :  { %276 = vsyncadd [#allocation4], 4294967168 }
 0x1ce   :  { %205 = vsyncpa [#allocation4], 1 }

</bundles_post_ra>
